<compile_context>
chip_gen: v5e
topology: v5e:2x2
jax: 0.10.0
libtpu: 0.0.40
codegen_flags: <defaults>
</compile_context>

<pallas_src>
import jax
import jax.numpy as jnp
import numpy as np
from jax.experimental import pallas as pl
from jax.experimental.pallas import tpu as pltpu


def _round_up(n: int, m: int) -> int:
    return ((n + m - 1) // m) * m


def _one_layer_classifier_kernel(xT_ref, w1T_ref, b1_ref, w2_ref, b2_ref, o_ref):
    """One batch tile: xT (F_in, TB) -> o (1, TB)."""
    f_in = xT_ref.shape[0]
    xT = xT_ref[...]                                    # (F_in, TB)
    # Hidden layer h = relu(W1 x + b1) as VPU broadcast FMAs.  A K=2 jnp.dot
    # would use 2/128 (v5e) .. 2/256 (v6e/v7x) of the MXU contraction dim and
    # pay a full push + result-FIFO pop for no useful work.
    h = w1T_ref[:, 0:1] * xT[0:1, :] + b1_ref[...]      # (H_pad, TB)
    for f in range(1, f_in):                            # static trip count (F_in=2)
        h = h + w1T_ref[:, f:f + 1] * xT[f:f + 1, :]
    h = jnp.maximum(h, 0.0)                             # ReLU
    # Final layer (N=1): elementwise multiply + sublane reduce instead of a
    # (TB,H)x(H,1) MXU op; b2 is read as a scalar from SMEM.
    logits = jnp.sum(h * w2_ref[...], axis=0, keepdims=True) + b2_ref[0, 0]
    o_ref[...] = jax.nn.sigmoid(logits).astype(o_ref.dtype)   # (1, TB) lane-dense


def one_layer_classifier(x, w1, b1, w2, b2, *, max_batch_tile=1024):
    """Forward pass of OneLayerClassifier.

    x:  (B, F_in) float32
    w1: (F_in, H) float32   (transpose of torch fc1.weight (H, F_in))
    b1: (1, H)    float32
    w2: (H, 1)    float32   (transpose of torch fc_final.weight (1, H))
    b2: (1, 1)    float32
    returns (B, 1) float32
    """
    B, f_in = x.shape
    H = w1.shape[1]
    H_pad = _round_up(H, 128)                       # 100 -> 128: full-lane vregs
    TB = min(max_batch_tile, _round_up(B, 128))     # batch (lane) tile, mult. of 128
    B_pad = _round_up(B, TB)
    num_tiles = B_pad // TB

    f32 = jnp.float32
    # Layout plumbing (cheap XLA ops outside the kernel): batch -> lanes,
    # hidden -> sublanes, zero-pad.  Padding is exact: padded hidden units get
    # relu(0)=0 and a zero w2 weight; padded batch columns are sliced away.
    xT = jnp.zeros((f_in, B_pad), f32).at[:, :B].set(x.T.astype(f32))
    w1T = jnp.zeros((H_pad, f_in), f32).at[:H, :].set(w1.T.astype(f32))
    b1c = jnp.zeros((H_pad, 1), f32).at[:H, :].set(b1.reshape(H, 1).astype(f32))
    w2c = jnp.zeros((H_pad, 1), f32).at[:H, :].set(w2.reshape(H, 1).astype(f32))
    b2s = b2.reshape(1, 1).astype(f32)

    cost = pl.CostEstimate(
        flops=2 * B_pad * (f_in * H_pad + H_pad),
        transcendentals=B_pad,                      # one exp per sigmoid
        bytes_accessed=4 * (xT.size + w1T.size + b1c.size + w2c.size
                            + b2s.size + num_tiles * TB),
    )

    out = pl.pallas_call(
        _one_layer_classifier_kernel,
        out_shape=jax.ShapeDtypeStruct((num_tiles, TB), f32),
        grid=(num_tiles,),
        in_specs=[
            # x tile walks the batch (lane) axis; weights/biases stay resident
            # in VMEM across all grid steps (index_map returns (0, 0)).
            pl.BlockSpec((f_in, TB), lambda i: (0, i)),
            pl.BlockSpec((H_pad, f_in), lambda i: (0, 0)),
            pl.BlockSpec((H_pad, 1), lambda i: (0, 0)),
            pl.BlockSpec((H_pad, 1), lambda i: (0, 0)),
            pl.BlockSpec(memory_space=pltpu.MemorySpace.SMEM),   # scalar b2
        ],
        out_specs=pl.BlockSpec((1, TB), lambda i: (i, 0)),       # lane-dense rows
        compiler_params=pltpu.CompilerParams(
            dimension_semantics=("parallel",)),                  # shard over v7x's 2 TCs
        cost_estimate=cost,
    )(xT, w1T, b1c, w2c, b2s)

    # (num_tiles, TB) -> (B, 1); row-major flatten preserves batch order.
    return out.reshape(B_pad, 1)[:B, :]


def init_params(key, in_features=2, out_features=100, factor=1.0):
    """Deterministic parameter init mirroring the torch module's __init__."""
    k1, k2, k3, k4 = jax.random.split(key, 4)
    # fc1.weight ~ N(0, 1/sqrt(in_features)) / factor, torch shape (H, F_in);
    # we store the transpose (F_in, H).
    w1 = (jax.random.normal(k1, (in_features, out_features), jnp.float32)
          * (1.0 / np.sqrt(in_features)) / factor)
    # torch Linear bias default: U(-1/sqrt(fan_in), 1/sqrt(fan_in))
    b1 = jax.random.uniform(
        k2, (1, out_features), jnp.float32,
        minval=-1.0 / np.sqrt(in_features), maxval=1.0 / np.sqrt(in_features))
    # fc_final.weight ~ N(0, 1/sqrt(out_features)) / factor, torch (1, H);
    # stored transposed (H, 1).
    w2 = (jax.random.normal(k3, (out_features, 1), jnp.float32)
          * (1.0 / np.sqrt(out_features)) / factor)
    b2 = jax.random.uniform(
        k4, (1, 1), jnp.float32,
        minval=-1.0 / np.sqrt(out_features), maxval=1.0 / np.sqrt(out_features))
    return w1, b1, w2, b2


def reference_forward(x, w1, b1, w2, b2):
    h = jnp.maximum(x @ w1 + b1, 0.0)
    return jax.nn.sigmoid(h @ w2 + b2)


if __name__ == "__main__":
    key = jax.random.PRNGKey(0)
    kx, kp = jax.random.split(key)

    B, F_IN, H = 8, 2, 100
    x = jax.random.normal(kx, (B, F_IN), jnp.float32)
    w1, b1, w2, b2 = init_params(kp, in_features=F_IN, out_features=H, factor=1.0)

    out = one_layer_classifier(x, w1, b1, w2, b2)
    out = jax.block_until_ready(out)

    ref = jax.block_until_ready(reference_forward(x, w1, b1, w2, b2))
    assert out.shape == (B, 1), out.shape
    np.testing.assert_allclose(np.asarray(out), np.asarray(ref), rtol=1e-5, atol=1e-5)

    print("KERNEL_OK")
</pallas_src>

<mosaic_0001>
module attributes {stable_mosaic.version = 11 : i64} {
  func.func @_one_layer_classifier_kernel(%arg0: i32, %arg1: memref<2x128xf32, #tpu.memory_space<vmem>>, %arg2: memref<128x2xf32, #tpu.memory_space<vmem>>, %arg3: memref<128x1xf32, #tpu.memory_space<vmem>>, %arg4: memref<128x1xf32, #tpu.memory_space<vmem>>, %arg5: memref<1x1xf32, #tpu.memory_space<smem>>, %arg6: memref<1x128xf32, #tpu.memory_space<vmem>>) attributes {dimension_semantics = [#tpu.dimension_semantics<parallel>], iteration_bounds = array<i64: 1>, scalar_prefetch = 0 : i64, scratch_operands = 0 : i64, tpu.core_type = #tpu.core_type<tc>, window_params = [{transform_indices = @transform_0, window_bounds = array<i64: 2, 128>}, {pipeline_mode = #tpu.pipeline_mode<synchronous>, transform_indices = @transform_1, window_bounds = array<i64: 128, 2>}, {pipeline_mode = #tpu.pipeline_mode<synchronous>, transform_indices = @transform_2, window_bounds = array<i64: 128, 1>}, {pipeline_mode = #tpu.pipeline_mode<synchronous>, transform_indices = @transform_3, window_bounds = array<i64: 128, 1>}, {transform_indices = @transform_4, window_bounds = array<i64: 1, 1>}, {transform_indices = @transform_5, window_bounds = array<i64: 1, 128>}]} {
    %c0 = arith.constant 0 : index
    %c0_0 = arith.constant 0 : index
    %0 = vector.load %arg1[%c0, %c0_0] : memref<2x128xf32, #tpu.memory_space<vmem>>, vector<2x128xf32>
    %c0_1 = arith.constant 0 : index
    %c0_2 = arith.constant 0 : index
    %1 = vector.load %arg2[%c0_1, %c0_2] : memref<128x2xf32, #tpu.memory_space<vmem>>, vector<128x1xf32>
    %2 = vector.extract_strided_slice %0 {offsets = [0, 0], sizes = [1, 128], strides = [1, 1]} : vector<2x128xf32> to vector<1x128xf32>
    %3 = vector.broadcast %1 : vector<128x1xf32> to vector<128x128xf32>
    %4 = vector.broadcast %2 : vector<1x128xf32> to vector<128x128xf32>
    %5 = arith.mulf %3, %4 : vector<128x128xf32>
    %c0_3 = arith.constant 0 : index
    %c0_4 = arith.constant 0 : index
    %6 = vector.load %arg3[%c0_3, %c0_4] : memref<128x1xf32, #tpu.memory_space<vmem>>, vector<128x1xf32>
    %7 = vector.broadcast %6 : vector<128x1xf32> to vector<128x128xf32>
    %8 = arith.addf %5, %7 : vector<128x128xf32>
    %c0_5 = arith.constant 0 : index
    %c1 = arith.constant 1 : index
    %9 = vector.load %arg2[%c0_5, %c1] : memref<128x2xf32, #tpu.memory_space<vmem>>, vector<128x1xf32>
    %10 = vector.extract_strided_slice %0 {offsets = [1, 0], sizes = [1, 128], strides = [1, 1]} : vector<2x128xf32> to vector<1x128xf32>
    %11 = vector.broadcast %9 : vector<128x1xf32> to vector<128x128xf32>
    %12 = vector.broadcast %10 : vector<1x128xf32> to vector<128x128xf32>
    %13 = arith.mulf %11, %12 : vector<128x128xf32>
    %14 = arith.addf %8, %13 : vector<128x128xf32>
    %cst = arith.constant 0.000000e+00 : f32
    %15 = vector.broadcast %cst : f32 to vector<128x128xf32>
    %16 = arith.maximumf %14, %15 : vector<128x128xf32>
    %c0_6 = arith.constant 0 : index
    %c0_7 = arith.constant 0 : index
    %17 = vector.load %arg4[%c0_6, %c0_7] : memref<128x1xf32, #tpu.memory_space<vmem>>, vector<128x1xf32>
    %18 = vector.broadcast %17 : vector<128x1xf32> to vector<128x128xf32>
    %19 = arith.mulf %16, %18 : vector<128x128xf32>
    %cst_8 = arith.constant dense<0.000000e+00> : vector<128xf32>
    %20 = vector.multi_reduction <add>, %19, %cst_8 [0] : vector<128x128xf32> to vector<128xf32>
    %21 = vector.shape_cast %20 : vector<128xf32> to vector<1x128xf32>
    %c0_9 = arith.constant 0 : index
    %c0_10 = arith.constant 0 : index
    %22 = memref.load %arg5[%c0_9, %c0_10] : memref<1x1xf32, #tpu.memory_space<smem>>
    %23 = vector.broadcast %22 : f32 to vector<1x128xf32>
    %24 = arith.addf %21, %23 : vector<1x128xf32>
    %25 = arith.negf %24 : vector<1x128xf32>
    %26 = math.exp %25 : vector<1x128xf32>
    %cst_11 = arith.constant 1.000000e+00 : f32
    %27 = vector.broadcast %cst_11 : f32 to vector<1x128xf32>
    %28 = arith.addf %27, %26 : vector<1x128xf32>
    %29 = arith.divf %27, %28 : vector<1x128xf32>
    %c0_12 = arith.constant 0 : index
    %c0_13 = arith.constant 0 : index
    %30 = vector.load %arg6[%c0_12, %c0_13] : memref<1x128xf32, #tpu.memory_space<vmem>>, vector<1x128xf32>
    tpu.vector_store %arg6[%c0_12, %c0_13], %29 {strides = array<i32>} : memref<1x128xf32, #tpu.memory_space<vmem>>, vector<1x128xf32>,
    return
  }
  func.func @transform_0(%arg0: i32) -> (i32, i32) {
    %c0_i32 = arith.constant 0 : i32
    %c0_i32_0 = arith.constant 0 : i32
    return %c0_i32, %arg0 : i32, i32
  }
  func.func @transform_1(%arg0: i32) -> (i32, i32) {
    %c0_i32 = arith.constant 0 : i32
    %c0_i32_0 = arith.constant 0 : i32
    %c0_i32_1 = arith.constant 0 : i32
    return %c0_i32, %c0_i32_0 : i32, i32
  }
  func.func @transform_2(%arg0: i32) -> (i32, i32) {
    %c0_i32 = arith.constant 0 : i32
    %c0_i32_0 = arith.constant 0 : i32
    %c0_i32_1 = arith.constant 0 : i32
    return %c0_i32, %c0_i32_0 : i32, i32
  }
  func.func @transform_3(%arg0: i32) -> (i32, i32) {
    %c0_i32 = arith.constant 0 : i32
    %c0_i32_0 = arith.constant 0 : i32
    %c0_i32_1 = arith.constant 0 : i32
    return %c0_i32, %c0_i32_0 : i32, i32
  }
  func.func @transform_4(%arg0: i32) -> (i32, i32) {
    %c0_i32 = arith.constant 0 : i32
    %c0_i32_0 = arith.constant 0 : i32
    %c0_i32_1 = arith.constant 0 : i32
    return %c0_i32, %c0_i32_0 : i32, i32
  }
  func.func @transform_5(%arg0: i32) -> (i32, i32) {
    %c0_i32 = arith.constant 0 : i32
    %c0_i32_0 = arith.constant 0 : i32
    return %arg0, %c0_i32 : i32, i32
  }
}

</mosaic_0001>

<bundles_post_ra>
// kernel: tpu_custom_call.1
= control target key start
LH: loop header
LB: loop body
LE: loop exit
PB: predicated region body
PF: predicated region fallthrough
CT: control target
= control target key end

     0   :  { %v578_v3 = vmov 0   ;;  %s933_s0 = inlined_call_operand.vmem [shape: f32[2,128], index: 0, kind: input, shape index: {}]   ;;  %s934_s1 = inlined_call_operand.vmem [shape: f32[128,2], index: 1, kind: input, shape index: {}]   ;;  %s935_s2 = inlined_call_operand.vmem [shape: f32[128,1], index: 2, kind: input, shape index: {}]   ;;  %s936_s3 = inlined_call_operand.vmem [shape: f32[128,1], index: 3, kind: input, shape index: {}]   ;;  %s937_s4 = inlined_call_operand.<no memory space> [shape: f32[1,1], index: 4, kind: input, shape index: {}]   ;;  %s938_s5 = inlined_call_operand.hbm [shape: f32[1,128], index: 5, kind: output, shape index: {}]  }
   0x1   :  { %v614_v0 = vld [vmem:[%s934_s1 + $0x20] sm:$0xff]  ;;  %v619_v1 = vld [vmem:[%s934_s1 + $0x10] sm:$0xff]  ;;  %539 = vset.pattern.permute.xlu2 %v578_v3  ;;  %538 = vset.pattern.permute.xlu1 %v578_v3 }
   0x2   :  { %v624_v2 = vld [vmem:[%s934_s1] sm:$0xff]  ;;  %537 = vset.pattern.permute.xlu0 %v578_v3  ;;  %61 = vperm.xlu2 %539, %v614_v0  }
   0x3   :  { %51 = vperm.xlu1 %538, %v619_v1   ;;  %41 = vperm.xlu0 %537, %v624_v2  }
   0x4   :  { %11 = vsyncpa [#allocation4], 0  ;;  %v635_v4 = vld [vmem:[%s934_s1 + $0x28] sm:$0xff]  ;;  %v640_v5 = vld [vmem:[%s934_s1 + $0x18] sm:$0xff]  ;;  %v579_v33 = vmov 1   ;;  %s580_s11 = smov [#allocation3]  }
   0x5   :  { %v645_v6 = vld [vmem:[%s934_s1 + $0x8] sm:$0xff]  ;;  %v653_v7 = vld [vmem:[%s934_s1 + $0x40] sm:$0xff]  ;;  %v658_v8 = vld [vmem:[%s934_s1 + $0x38] sm:$0xff]  ;;  %s522_s12 = sshll.u32 %s580_s11, 4  ;;  %s523_s12 = int_to_ptr.vmem [resolvable:$true] %s522_s12 }
   0x6   :  { %v663_v9 = vld [vmem:[%s934_s1 + $0x30] sm:$0xff]  ;;  %v671_v10 = vld [vmem:[%s934_s1 + $0x58] sm:$0xff]  ;;  %v681_v12 = vld [vmem:[%s934_s1 + $0x48] sm:$0xff] }
   0x7   :  { %v676_v11 = vld [vmem:[%s934_s1 + $0x50] sm:$0xff]  ;;  %v694_v14 = vld [vmem:[%s934_s1 + $0x68] sm:$0xff]  ;;  %v699_v15 = vld [vmem:[%s934_s1 + $0x60] sm:$0xff] }
   0x8   :  { %v689_v13 = vld [vmem:[%s934_s1 + $0x70] sm:$0xff]  ;;  %v137_v16 = vld [vmem:[%s935_s2 + $0x8] sm:$0xff]  ;;  %v136_v17 = vld [vmem:[%s935_s2] sm:$0xff] }
   0x9   :  { %v713_v18 = vld [vmem:[%s934_s1 + $0x78] sm:$0xff]  ;;  %v140_v19 = vld [vmem:[%s935_s2 + $0x20] sm:$0xff]  ;;  %v138_v21 = vld [vmem:[%s935_s2 + $0x10] sm:$0xff] }
   0xa   :  { %66 = vperm.xlu2 %539, %v635_v4   ;;  %v139_v20 = vld [vmem:[%s935_s2 + $0x18] sm:$0xff]  ;;  %v142_v23 = vld [vmem:[%s935_s2 + $0x30] sm:$0xff]  ;;  %v141_v24 = vld [vmem:[%s935_s2 + $0x28] sm:$0xff] }
   0xb   :  { %56 = vperm.xlu1 %538, %v640_v5   ;;  %46 = vperm.xlu0 %537, %v645_v6   ;;  %v143_v22 = vld [vmem:[%s935_s2 + $0x38] sm:$0xff]  ;;  %v146_v25 = vld [vmem:[%s935_s2 + $0x50] sm:$0xff]  ;;  %v145_v26 = vld [vmem:[%s935_s2 + $0x48] sm:$0xff] }
   0xc   :  { %v144_v27 = vld [vmem:[%s935_s2 + $0x40] sm:$0xff]  ;;  %v149_v28 = vld [vmem:[%s935_s2 + $0x68] sm:$0xff]  ;;  %v147_v30 = vld [vmem:[%s935_s2 + $0x58] sm:$0xff] }
   0xd   :  { %v148_v29 = vld [vmem:[%s935_s2 + $0x60] sm:$0xff]  ;;  %v151_v31 = vld [vmem:[%s935_s2 + $0x78] sm:$0xff]  ;;  %v150_v32 = vld [vmem:[%s935_s2 + $0x70] sm:$0xff] }
   0xe   :  { %v363_v34 = vld [vmem:[%s936_s3 + $0x10] sm:$0xff]  ;;  %v368_v36 = vld [vmem:[%s936_s3 + $0x38] sm:$0xff]  ;;  %v361_v42 = vld [vmem:[%s936_s3] sm:$0xff] }
   0xf   :  { %v362_v43 = vld [vmem:[%s936_s3 + $0x8] sm:$0xff]  ;;  %v793_v44 = vld [vmem:[%s933_s0] sm:$0x3]  ;;  %v364_v50 = vld [vmem:[%s936_s3 + $0x18] sm:$0xff] }
  0x10   :  { %v801_v48 = vperm.slane %v793_v44, 0  ;;  %v365_v51 = vld [vmem:[%s936_s3 + $0x20] sm:$0xff]  ;;  %v366_v56 = vld [vmem:[%s936_s3 + $0x28] sm:$0xff]  ;;  %v367_v58 = vld [vmem:[%s936_s3 + $0x30] sm:$0xff] }
  0x11   :  { %v369_v63 = vld [vmem:[%s936_s3 + $0x40] sm:$0xff] }
  0x12   :  { %81 = vperm.xlu2 %539, %v653_v7  }
  0x13   :  { %76 = vperm.xlu1 %538, %v658_v8   ;;  %71 = vperm.xlu0 %537, %v663_v9  }
  0x1a   :  { %96 = vperm.xlu2 %539, %v671_v10  }
  0x1b   :  { %91 = vperm.xlu1 %538, %v676_v11   ;;  %86 = vperm.xlu0 %537, %v681_v12  }
  0x22   :  { %111 = vperm.xlu2 %539, %v689_v13  }
  0x23   :  { %106 = vperm.xlu1 %538, %v694_v14   ;;  %101 = vperm.xlu0 %537, %v699_v15  }
  0x2a   :  { %159 = vperm.xlu2 %539, %v137_v16  }
  0x2b   :  { %154 = vperm.xlu1 %538, %v136_v17   ;;  %116 = vperm.xlu0 %537, %v713_v18   ;;  %v372_v17 = vld [vmem:[%s936_s3 + $0x58] sm:$0xff] }
  0x32   :  { %174 = vperm.xlu2 %539, %v140_v19  }
  0x33   :  { %169 = vperm.xlu1 %538, %v139_v20   ;;  %164 = vperm.xlu0 %537, %v138_v21  }
  0x3a   :  { %189 = vperm.xlu2 %539, %v143_v22  }
  0x3b   :  { %184 = vperm.xlu1 %538, %v142_v23   ;;  %179 = vperm.xlu0 %537, %v141_v24  }
  0x42   :  { %204 = vperm.xlu2 %539, %v146_v25  }
  0x43   :  { %199 = vperm.xlu1 %538, %v145_v26   ;;  %194 = vperm.xlu0 %537, %v144_v27  }
  0x4a   :  { %219 = vperm.xlu2 %539, %v149_v28  }
  0x4b   :  { %214 = vperm.xlu1 %538, %v148_v29   ;;  %209 = vperm.xlu0 %537, %v147_v30  }
  0x52   :  { %540 = vset.pattern.permute.xlu2 %v579_v33 }
  0x53   :  { %229 = vperm.xlu1 %538, %v151_v31   ;;  %224 = vperm.xlu0 %537, %v150_v32   ;;  %v375_v32 = vld [vmem:[%s936_s3 + $0x70] sm:$0xff] }
  0x54   :  { %249 = vperm.xlu2 %540, %v624_v2   ;;  %v373_v2 = vld [vmem:[%s936_s3 + $0x60] sm:$0xff] }
  0x5b   :  { %541 = vset.pattern.permute.xlu1 %v579_v33  ;;  %389 = vperm.xlu0 %537, %v363_v34  }
  0x5c   :  { %257 = vperm.xlu1 %541, %v619_v1   ;;  %261 = vperm.xlu2 %540, %v640_v5   ;;  %v62_v35 = vpop.permute.xlu2 %61  ;;  %v370_v1 = vld [vmem:[%s936_s3 + $0x48] sm:$0xff] }
  0x5d   :  { %v124_v57 = vmul.f32 %v801_v48, %v62_v35  ;;  %v376_v35 = vld [vmem:[%s936_s3 + $0x78] sm:$0xff] }
  0x63   :  { %414 = vperm.xlu0 %537, %v368_v36  }
  0x64   :  { %265 = vperm.xlu1 %541, %v614_v0   ;;  %269 = vperm.xlu2 %540, %v635_v4   ;;  %v771_v37 = vpop.permute.xlu2 %66 }
  0x65   :  { %v125_v28 = vmul.f32 %v801_v48, %v771_v37 }
  0x6b   :  { %544 = vset.pattern.permute.xlu0 %v579_v33 }
  0x6c   :  { %277 = vperm.xlu1 %541, %v658_v8   ;;  %281 = vperm.xlu2 %540, %v653_v7   ;;  %v776_v38 = vpop.permute.xlu2 %81  ;;  %v371_v8 = vld [vmem:[%s936_s3 + $0x50] sm:$0xff] }
  0x6d   :  { %253 = vperm.xlu0 %544, %v645_v6   ;;  %v128_v36 = vmul.f32 %v801_v48, %v776_v38 }
  0x74   :  { %289 = vperm.xlu1 %541, %v676_v11   ;;  %293 = vperm.xlu2 %540, %v671_v10   ;;  %v781_v39 = vpop.permute.xlu2 %96 }
  0x75   :  { %273 = vperm.xlu0 %544, %v663_v9   ;;  %v52_v40 = vpop.permute.xlu1 %51  ;;  %v42_v41 = vpop.permute.xlu0 %41 }
  0x76   :  { %v120_v10 = vmul.f32 %v801_v48, %v42_v41  ;;  %v122_v20 = vmul.f32 %v801_v48, %v52_v40 }
  0x7c   :  { %542 = vset.pattern.permute.xlu1 %v578_v3  ;;  %543 = vset.pattern.permute.xlu2 %v578_v3  ;;  %v797_v45 = vpop.permute.xlu2 %111 }
  0x7d   :  { %285 = vperm.xlu0 %544, %v681_v12   ;;  %379 = vperm.xlu1 %542, %v361_v42   ;;  %v57_v46 = vpop.permute.xlu1 %56  ;;  %v47_v47 = vpop.permute.xlu0 %46 }
  0x7e   :  { %384 = vperm.xlu2 %543, %v362_v43   ;;  %v121_v49 = vmul.f32 %v801_v48, %v47_v47  ;;  %v123_v21 = vmul.f32 %v801_v48, %v57_v46 }
  0x84   :  { %v160_v52 = vpop.permute.xlu2 %159 }
  0x85   :  { %297 = vperm.xlu0 %544, %v699_v15   ;;  %v811_v53 = vadd.f32 %v160_v52, %v121_v49  ;;  %394 = vperm.xlu1 %542, %v364_v50   ;;  %v77_v54 = vpop.permute.xlu1 %76  ;;  %v72_v55 = vpop.permute.xlu0 %71 }
  0x86   :  { %399 = vperm.xlu2 %543, %v365_v51   ;;  %v127_v0 = vmul.f32 %v801_v48, %v77_v54  ;;  %v126_v29 = vmul.f32 %v801_v48, %v72_v55 }
  0x8c   :  { %v175_v59 = vpop.permute.xlu2 %174 }
  0x8d   :  { %301 = vperm.xlu0 %544, %v694_v14   ;;  %v821_v60 = vadd.f32 %v175_v59, %v124_v57  ;;  %404 = vperm.xlu1 %542, %v366_v56   ;;  %v92_v61 = vpop.permute.xlu1 %91  ;;  %v87_v62 = vpop.permute.xlu0 %86 }
  0x8e   :  { %409 = vperm.xlu2 %543, %v367_v58   ;;  %v130_v9 = vmul.f32 %v801_v48, %v92_v61  ;;  %v129_v37 = vmul.f32 %v801_v48, %v87_v62 }
  0x94   :  { %v190_v4 = vpop.permute.xlu2 %189 }
  0x95   :  { %546 = vset.pattern.permute.xlu0 %v578_v3  ;;  %v834_v5 = vadd.f32 %v190_v4, %v127_v0  ;;  %419 = vperm.xlu1 %542, %v369_v63   ;;  %v107_v6 = vpop.permute.xlu1 %106  ;;  %v102_v7 = vpop.permute.xlu0 %101 }
  0x96   :  { %424 = vperm.xlu2 %543, %v370_v1   ;;  %439 = vperm.xlu0 %546, %v373_v2   ;;  %v133_v19 = vmul.f32 %v801_v48, %v107_v6  ;;  %v132_v47 = vmul.f32 %v801_v48, %v102_v7  ;;  %v893_v2 = vperm.slane %v793_v44, 1 }
  0x9c   :  { %v205_v11 = vpop.permute.xlu2 %204 }
  0x9d   :  { %v841_v12 = vadd.f32 %v205_v11, %v130_v9  ;;  %429 = vperm.xlu1 %542, %v371_v8   ;;  %v155_v14 = vpop.permute.xlu1 %154  ;;  %v117_v15 = vpop.permute.xlu0 %116 }
  0x9e   :  { %v232_v16 = vadd.f32 %v155_v14, %v120_v10  ;;  %545 = vset.pattern.permute.xlu2 %v579_v33  ;;  %v135_v52 = vmul.f32 %v801_v48, %v117_v15 }
  0x9f   :  { %305 = vperm.xlu2 %545, %v689_v13   ;;  %v374_v13 = vld [vmem:[%s936_s3 + $0x68] sm:$0xff] }
  0xa4   :  { %v220_v22 = vpop.permute.xlu2 %219 }
  0xa5   :  { %v851_v23 = vadd.f32 %v220_v22, %v133_v19  ;;  %434 = vperm.xlu1 %542, %v372_v17   ;;  %v170_v24 = vpop.permute.xlu1 %169  ;;  %v165_v25 = vpop.permute.xlu0 %164 }
  0xa6   :  { %v235_v26 = vadd.f32 %v170_v24, %v123_v21  ;;  %v234_v27 = vadd.f32 %v165_v25, %v122_v20 }
  0xa7   :  { %309 = vperm.xlu2 %545, %v713_v18  }
  0xad   :  { %444 = vperm.xlu1 %542, %v374_v13   ;;  %v185_v30 = vpop.permute.xlu1 %184  ;;  %v180_v31 = vpop.permute.xlu0 %179 }
  0xae   :  { %v863_v33 = vadd.f32 %v185_v30, %v126_v29  ;;  %v865_v34 = vadd.f32 %v180_v31, %v125_v28  ;;  %v250_v18 = vpop.permute.xlu2 %249 }
  0xaf   :  { %547 = vset.pattern.permute.xlu2 %v578_v3  ;;  %v131_v3 = vmul.f32 %v801_v48, %v781_v39  ;;  %v313_v7 = vmul.f32 %v893_v2, %v250_v18 }
  0xb0   :  { %449 = vperm.xlu2 %547, %v375_v32  }
  0xb1   :  { %v329_v11 = vadd.f32 %v313_v7, %v232_v16 }
  0xb3   :  { %v345_v21 = vmax.f32 %v329_v11, 0.0 }
  0xb5   :  { %454 = vperm.xlu1 %542, %v376_v35   ;;  %v200_v40 = vpop.permute.xlu1 %199  ;;  %v195_v41 = vpop.permute.xlu0 %194 }
  0xb6   :  { %v874_v42 = vadd.f32 %v200_v40, %v129_v37  ;;  %v876_v43 = vadd.f32 %v195_v41, %v128_v36  ;;  %v262_v46 = vpop.permute.xlu2 %261 }
  0xb7   :  { %v316_v19 = vmul.f32 %v893_v2, %v262_v46 }
  0xb9   :  { %v332_v28 = vadd.f32 %v316_v19, %v235_v26 }
  0xbb   :  { %v348_v32 = vmax.f32 %v332_v28, 0.0 }
  0xbd   :  { %v215_v49 = vpop.permute.xlu1 %214  ;;  %v210_v50 = vpop.permute.xlu0 %209 }
  0xbe   :  { %v881_v51 = vadd.f32 %v215_v49, %v132_v47  ;;  %v883_v38 = vadd.f32 %v210_v50, %v131_v3  ;;  %v270_v54 = vpop.permute.xlu2 %269 }
  0xbf   :  { %v318_v16 = vmul.f32 %v893_v2, %v270_v54 }
  0xc1   :  { %v334_v46 = vadd.f32 %v318_v16, %v865_v34  ;;  %v134_v16 = vmul.f32 %v801_v48, %v797_v45 }
  0xc5   :  { %v230_v55 = vpop.permute.xlu1 %229  ;;  %v886_v56 = vpop.permute.xlu0 %224 }
  0xc6   :  { %v888_v57 = vadd.f32 %v230_v55, %v135_v52  ;;  %v282_v61 = vpop.permute.xlu2 %281  ;;  %v350_v55 = vmax.f32 %v334_v46, 0.0 }
  0xc7   :  { %v321_v50 = vmul.f32 %v893_v2, %v282_v61 }
  0xcd   :  { %v390_v58 = vpop.permute.xlu0 %389 }
  0xce   :  { %v258_v59 = vpop.permute.xlu1 %257  ;;  %v890_v63 = vpop.permute.xlu2 %293 }
  0xcf   :  { %v315_v8 = vmul.f32 %v893_v2, %v258_v59 }
  0xd1   :  { %v331_v14 = vadd.f32 %v315_v8, %v234_v27 }
  0xd3   :  { %v347_v20 = vmax.f32 %v331_v14, 0.0 }
  0xd5   :  { %v415_v62 = vpop.permute.xlu0 %414  ;;  %v459_v29 = vmul.f32 %v390_v58, %v347_v20 }
  0xd6   :  { %v266_v39 = vpop.permute.xlu1 %265 }
  0xd7   :  { %v317_v24 = vmul.f32 %v893_v2, %v266_v39 }
  0xd8   :  { %v385_v4 = vpop.permute.xlu2 %384 }
  0xd9   :  { %v333_v31 = vadd.f32 %v317_v24, %v821_v60 }
  0xdb   :  { %v349_v37 = vmax.f32 %v333_v31, 0.0 }
  0xde   :  { %v278_v0 = vpop.permute.xlu1 %277 }
  0xdf   :  { %v254_v1 = vpop.permute.xlu0 %253  ;;  %v320_v36 = vmul.f32 %v893_v2, %v278_v0 }
  0xe0   :  { %v314_v6 = vmul.f32 %v893_v2, %v254_v1  ;;  %v400_v17 = vpop.permute.xlu2 %399  ;;  %v337_v1 = vadd.f32 %v321_v50, %v876_v43 }
  0xe1   :  { %v461_v26 = vmul.f32 %v400_v17, %v349_v37  ;;  %v336_v60 = vadd.f32 %v320_v36, %v834_v5 }
  0xe2   :  { %v330_v10 = vadd.f32 %v314_v6, %v811_v53 }
  0xe3   :  { %v352_v59 = vmax.f32 %v336_v60, 0.0 }
  0xe4   :  { %v346_v15 = vmax.f32 %v330_v10, 0.0  ;;  %v353_v10 = vmax.f32 %v337_v1, 0.0 }
  0xe5   :  { %v464_v7 = vmul.f32 %v415_v62, %v352_v59 }
  0xe6   :  { %v290_v9 = vpop.permute.xlu1 %289  ;;  %v458_v13 = vmul.f32 %v385_v4, %v346_v15 }
  0xe7   :  { %v274_v44 = vpop.permute.xlu0 %273  ;;  %v323_v8 = vmul.f32 %v893_v2, %v290_v9 }
  0xe8   :  { %v319_v27 = vmul.f32 %v893_v2, %v274_v44  ;;  %v410_v18 = vpop.permute.xlu2 %409 }
  0xe9   :  { %v339_v17 = vadd.f32 %v323_v8, %v841_v12 }
  0xea   :  { %v335_v3 = vadd.f32 %v319_v27, %v863_v33 }
  0xec   :  { %v351_v52 = vmax.f32 %v335_v3, 0.0 }
  0xee   :  { %v463_v34 = vmul.f32 %v410_v18, %v351_v52  ;;  %v246_v18 = vadd.f32 %v886_v56, %v134_v16 }
  0xef   :  { %v380_v22 = vpop.permute.xlu1 %379  ;;  %v286_v41 = vpop.permute.xlu0 %285 }
  0xf0   :  { %v457_v25 = vmul.f32 %v380_v22, %v345_v21  ;;  %v322_v54 = vmul.f32 %v893_v2, %v286_v41  ;;  %v425_v0 = vpop.permute.xlu2 %424  ;;  %v355_v22 = vmax.f32 %v339_v17, 0.0 }
  0xf2   :  { %v473_v30 = vadd.f32 %v458_v13, %v457_v25  ;;  %v338_v4 = vadd.f32 %v322_v54, %v874_v42  ;;  %v324_v42 = vmul.f32 %v893_v2, %v890_v63 }
  0xf4   :  { %v474_v53 = vadd.f32 %v473_v30, %v459_v29  ;;  %v354_v61 = vmax.f32 %v338_v4, 0.0  ;;  %v340_v25 = vadd.f32 %v324_v42, %v883_v38 }
  0xf6   :  { %v466_v19 = vmul.f32 %v425_v0, %v354_v61  ;;  %v356_v30 = vmax.f32 %v340_v25, 0.0 }
  0xf7   :  { %v395_v35 = vpop.permute.xlu1 %394  ;;  %v298_v6 = vpop.permute.xlu0 %297 }
  0xf8   :  { %v460_v40 = vmul.f32 %v395_v35, %v348_v32  ;;  %v325_v24 = vmul.f32 %v893_v2, %v298_v6 }
  0xf9   :  { %v306_v21 = vpop.permute.xlu2 %305 }
  0xfa   :  { %v475_v47 = vadd.f32 %v474_v53, %v460_v40  ;;  %v341_v28 = vadd.f32 %v325_v24, %v881_v51  ;;  %v327_v63 = vmul.f32 %v893_v2, %v306_v21 }
  0xfc   :  { %v476_v49 = vadd.f32 %v475_v47, %v461_v26  ;;  %v357_v27 = vmax.f32 %v341_v28, 0.0  ;;  %v343_v51 = vadd.f32 %v327_v63, %v246_v18 }
  0xfe   :  { %v359_v3 = vmax.f32 %v343_v51, 0.0 }
  0xff   :  { %v405_v58 = vpop.permute.xlu1 %404  ;;  %v302_v44 = vpop.permute.xlu0 %301 }
 0x100   :  { %v462_v39 = vmul.f32 %v405_v58, %v350_v55  ;;  %v326_v12 = vmul.f32 %v893_v2, %v302_v44 }
 0x101   :  { %v310_v29 = vpop.permute.xlu2 %309 }
 0x102   :  { %v477_v33 = vadd.f32 %v476_v49, %v462_v39  ;;  %v342_v38 = vadd.f32 %v326_v12, %v851_v23  ;;  %v328_v40 = vmul.f32 %v893_v2, %v310_v29  ;;  %v495_v2 = vstv %s937_s4  ;;  %s524_s4 = sshll.u32 %s938_s5, 4  ;;  %s525_s4 = int_to_ptr.hbm [resolvable:$true] %s524_s4 }
 0x104   :  { %v478_v5 = vadd.f32 %v477_v33, %v463_v34  ;;  %v358_v41 = vmax.f32 %v342_v38, 0.0  ;;  %v344_v45 = vadd.f32 %v328_v40, %v888_v57 }
 0x106   :  { %v479_v11 = vadd.f32 %v478_v5, %v464_v7  ;;  %v360_v50 = vmax.f32 %v344_v45, 0.0 }
 0x107   :  { %v420_v14 = vpop.permute.xlu1 %419 }
 0x108   :  { %v465_v15 = vmul.f32 %v420_v14, %v353_v10  ;;  %v440_v31 = vpop.permute.xlu0 %439 }
 0x109   :  { %v469_v35 = vmul.f32 %v440_v31, %v357_v27 }
 0x10a   :  { %v480_v20 = vadd.f32 %v479_v11, %v465_v15  ;;  %v450_v46 = vpop.permute.xlu2 %449 }
 0x10b   :  { %v471_v48 = vmul.f32 %v450_v46, %v359_v3 }
 0x10c   :  { %v481_v43 = vadd.f32 %v480_v20, %v466_v19 }
 0x10f   :  { %v430_v62 = vpop.permute.xlu1 %429 }
 0x110   :  { %v467_v9 = vmul.f32 %v430_v62, %v355_v22 }
 0x112   :  { %v482_v13 = vadd.f32 %v481_v43, %v467_v9 }
 0x117   :  { %v435_v53 = vpop.permute.xlu1 %434 }
 0x118   :  { %v468_v32 = vmul.f32 %v435_v53, %v356_v30 }
 0x11a   :  { %v483_v36 = vadd.f32 %v482_v13, %v468_v32 }
 0x11c   :  { %v484_v37 = vadd.f32 %v483_v36, %v469_v35 }
 0x11f   :  { %v445_v26 = vpop.permute.xlu1 %444 }
 0x120   :  { %v470_v47 = vmul.f32 %v445_v26, %v358_v41 }
 0x122   :  { %v485_v60 = vadd.f32 %v484_v37, %v470_v47 }
 0x124   :  { %v486_v49 = vadd.f32 %v485_v60, %v471_v48 }
 0x127   :  { %v455_v56 = vpop.permute.xlu1 %454 }
 0x128   :  { %v472_v52 = vmul.f32 %v455_v56, %v360_v50 }
 0x12a   :  { %v487_v23 = vadd.f32 %v486_v49, %v472_v52 }
 0x12c   :  { %v488_v54 = vrot.slane %v487_v23, 4 }
 0x12e   :  { %v489_v55 = vadd.f32 %v488_v54, %v487_v23 }
 0x130   :  { %v490_v58 = vrot.slane %v489_v55, 2 }
 0x132   :  { %v491_v59 = vadd.f32 %v490_v58, %v489_v55 }
 0x134   :  { %v492_v39 = vrot.slane %v491_v59, 1 }
 0x136   :  { %v493_v0 = vadd.f32 %v492_v39, %v491_v59 }
 0x138   :  { %v496_v1 = vadd.f32 %v495_v2, %v493_v0 }
 0x13a   :  { %v533_v34 = vmul.f32 -1.442695, %v496_v1 }
 0x13c   :  { %548 = vpow2.f32 %v533_v34 }
 0x142   :  { %v549_v57 = vpop.eup %548 }
 0x143   :  { %v500_v4 = vadd.f32 1.0, %v549_v57 }
 0x145   :  { %550 = vrcp.f32 %v500_v4  ;;  %v512_v5 = vand.u32 2147483648, %v500_v4  ;;  %v510_v61 = vand.u32 2147483647, %v500_v4  ;;  %vm506_vm1 = vweird.f32 %v500_v4 }
 0x147   :  { %v513_v11 = vor.u32 1.1754944e-38, %v512_v5  ;;  %vm511_vm3 = vcmp.eq.f32.partialorder %v510_v61, 8.507059e+37 }
 0x14b   :  { %v551_v33 = vpop.eup %550 }
 0x14c   :  { %v502_v6 = vmul.f32 %v551_v33, %v500_v4  ;;  %vm507_vm0 = vweird.f32 %v551_v33 }
 0x14d   :  { %vm508_vm2 = vmor %vm506_vm1, %vm507_vm0 }
 0x14e   :  { %v503_v7 = vsub.f32 1.0, %v502_v6 }
 0x150   :  { %v504_v8 = vmul.f32 %v551_v33, %v503_v7 }
 0x152   :  { %v505_v10 = vadd.f32 %v551_v33, %v504_v8 }
 0x154   :  { %v509_v14 = vsel %vm508_vm2, %v551_v33, %v505_v10 }
 0x155   :  { %v514_v15 = vsel %vm511_vm3, %v513_v11, %v509_v14 }
 0x156   :  { %516 = vst [vmem:[#allocation3] sm:$0x1] %v514_v15 }
 0x157   :  { %527 = dma.vmem_to_hbm [thread:$0]  %s523_s12, 16, %s525_s4, [#allocation4]  }
 0x158   :  { %576 = dma.done.wait [#allocation4], 16  }
 0x159   :  { %577 = vsyncadd [#allocation4], 4294967280 }
 0x15a   :  { %532 = vsyncpa [#allocation4], 1 }

</bundles_post_ra>
